<compile_context>
chip_gen: v5e
topology: v5e:2x2
jax: 0.10.0
libtpu: 0.0.40
codegen_flags: <defaults>
</compile_context>

<pallas_src>
import functools

import jax
import jax.numpy as jnp
from jax.experimental import pallas as pl
from jax.experimental.pallas import tpu as pltpu

EPS = 1e-6


def _round_up(n, m):
    return ((n + m - 1) // m) * m


def _encoder_layer_kernel(x_ref, w1_ref, w2_ref, p_ref, o_ref, *,
                          d_real, d_pad, dff_pad, matmul_dtype):
    x = x_ref[...]                                   # (tm, D_pad) f32

    # packed per-feature params: row0=b1, row1=b2, row2=gamma, row3=beta
    b1 = p_ref[0:1, :dff_pad]                        # (1, Dff_pad)
    b2 = p_ref[1:2, :d_pad]                          # (1, D_pad)
    gamma = p_ref[2:3, :d_pad]
    beta = p_ref[3:4, :d_pad]

    # --- position-wise feed-forward: two MXU matmuls (f32 accumulation) ---
    xm = x.astype(matmul_dtype)
    h = jnp.dot(xm, w1_ref[...].astype(matmul_dtype),
                preferred_element_type=jnp.float32) + b1
    h = jnp.maximum(h, 0.0)                          # ReLU
    f = jnp.dot(h.astype(matmul_dtype), w2_ref[...].astype(matmul_dtype),
                preferred_element_type=jnp.float32) + b2

    # --- residual add (padded lanes of x and f are exactly 0 -> z pad = 0) ---
    z = x + f                                        # (tm, D_pad)

    # --- LayerNorm, fused single-pass statistics over the real D lanes ---
    s1 = jnp.sum(z, axis=-1, keepdims=True)          # == sum over real lanes
    s2 = jnp.sum(z * z, axis=-1, keepdims=True)      # padded lanes contribute 0
    mean = s1 / d_real
    var_unbiased = (s2 - d_real * mean * mean) / (d_real - 1)
    std = jnp.sqrt(jnp.maximum(var_unbiased, 0.0))
    inv = pl.reciprocal(std + EPS, approx=False)     # EUP, frees VALU slots
    o_ref[...] = gamma * ((z - mean) * inv) + beta
    # Dropout: identity in eval mode.


def encoder_layer_no_attention(x, w1, b1, w2, b2, gamma, beta, *,
                               tm=256, matmul_dtype=jnp.float32):
    """x: [B, S, D]. Returns [B, S, D] float32.

    matmul_dtype=jnp.bfloat16 enables the native bf16 MXU path (v6e/v7x);
    accumulation stays f32. Default f32 matches the PyTorch module exactly.
    """
    B, S, D = x.shape
    Dff = w1.shape[1]
    rows = B * S

    # Lane-dense feature dims (multiples of 128).
    D_pad = _round_up(D, 128)
    Dff_pad = _round_up(Dff, 128)
    Pmax = max(D_pad, Dff_pad)

    # Row tile: as large as requested, capped to the (sublane-rounded) row
    # count; rows are zero-padded to a tile multiple and sliced off afterwards.
    tm_eff = min(tm, _round_up(rows, 8))
    rows_pad = _round_up(rows, tm_eff)
    grid = (rows_pad // tm_eff,)

    x2 = jnp.zeros((rows_pad, D_pad), jnp.float32)
    x2 = x2.at[:rows, :D].set(x.reshape(rows, D).astype(jnp.float32))

    w_dt = matmul_dtype
    w1_p = jnp.zeros((D_pad, Dff_pad), w_dt).at[:D, :Dff].set(w1.astype(w_dt))
    w2_p = jnp.zeros((Dff_pad, D_pad), w_dt).at[:Dff, :D].set(w2.astype(w_dt))

    # Pack the four small per-feature vectors into one resident VMEM block.
    params = jnp.zeros((4, Pmax), jnp.float32)
    params = params.at[0, :Dff].set(b1.astype(jnp.float32))
    params = params.at[1, :D].set(b2.astype(jnp.float32))
    params = params.at[2, :D].set(gamma.astype(jnp.float32))
    params = params.at[3, :D].set(beta.astype(jnp.float32))

    # VMEM budget: resident weights + packed params + double-buffered x/out
    # tiles + FFN hidden intermediate; clamp to stay within v7x's 64 MiB.
    wbytes = jnp.dtype(w_dt).itemsize
    est = (2 * D_pad * Dff_pad * wbytes
           + 4 * Pmax * 4
           + 2 * 2 * tm_eff * D_pad * 4
           + tm_eff * Dff_pad * 4)
    vmem_limit = int(min(max(2 * est, 32 * 1024 * 1024), 64 * 1024 * 1024))

    kernel = functools.partial(
        _encoder_layer_kernel,
        d_real=D, d_pad=D_pad, dff_pad=Dff_pad, matmul_dtype=matmul_dtype)

    out2 = pl.pallas_call(
        kernel,
        out_shape=jax.ShapeDtypeStruct((rows_pad, D_pad), jnp.float32),
        grid_spec=pltpu.PrefetchScalarGridSpec(
            num_scalar_prefetch=0,
            grid=grid,
            in_specs=[
                pl.BlockSpec((tm_eff, D_pad), lambda i: (i, 0)),     # x rows
                pl.BlockSpec((D_pad, Dff_pad), lambda i: (0, 0)),    # W1 (resident)
                pl.BlockSpec((Dff_pad, D_pad), lambda i: (0, 0)),    # W2 (resident)
                pl.BlockSpec((4, Pmax), lambda i: (0, 0)),           # packed b1/b2/gamma/beta
            ],
            out_specs=pl.BlockSpec((tm_eff, D_pad), lambda i: (i, 0)),
        ),
        compiler_params=pltpu.CompilerParams(
            dimension_semantics=("parallel",),     # shards rows across v7x's 2 TCs
            vmem_limit_bytes=vmem_limit),
    )(x2, w1_p, w2_p, params)

    return out2[:rows, :D].reshape(B, S, D)


def _reference(x, w1, b1, w2, b2, gamma, beta):
    h = jnp.maximum(x @ w1 + b1, 0.0)
    f = h @ w2 + b2
    z = x + f
    mean = z.mean(-1, keepdims=True)
    std = jnp.sqrt(((z - mean) ** 2).sum(-1, keepdims=True) / (z.shape[-1] - 1))
    return gamma * (z - mean) / (std + EPS) + beta


if __name__ == "__main__":
    B, S, D, Dff = 2, 8, 32, 64
    key = jax.random.PRNGKey(0)
    kx, k1, k2, k3, k4 = jax.random.split(key, 5)

    x = jax.random.normal(kx, (B, S, D), dtype=jnp.float32)
    w1 = jax.random.normal(k1, (D, Dff), dtype=jnp.float32) * 0.05
    b1 = jax.random.normal(k2, (Dff,), dtype=jnp.float32) * 0.05
    w2 = jax.random.normal(k3, (Dff, D), dtype=jnp.float32) * 0.05
    b2 = jax.random.normal(k4, (D,), dtype=jnp.float32) * 0.05
    gamma = jnp.ones((D,), dtype=jnp.float32)   # LayerNorm a_2
    beta = jnp.zeros((D,), dtype=jnp.float32)   # LayerNorm b_2

    ref = _reference(x, w1, b1, w2, b2, gamma, beta)

    # Exact (f32) path: must match the PyTorch-equivalent reference tightly.
    out = encoder_layer_no_attention(x, w1, b1, w2, b2, gamma, beta)
    out = jax.block_until_ready(out)
    assert jnp.allclose(out, ref, atol=1e-5, rtol=1e-5), "f32 path mismatch vs reference"

    # bf16 MXU path (v6e/v7x perf mode): looser tolerance, numerics differ slightly.
    out_bf16 = encoder_layer_no_attention(x, w1, b1, w2, b2, gamma, beta,
                                          matmul_dtype=jnp.bfloat16)
    out_bf16 = jax.block_until_ready(out_bf16)
    assert jnp.allclose(out_bf16, ref, atol=5e-2, rtol=5e-2), "bf16 path mismatch vs reference"

    print("KERNEL_OK")
</pallas_src>

<mosaic_0001>
module attributes {stable_mosaic.version = 11 : i64} {
  func.func @_encoder_layer_kernel(%arg0: i32, %arg1: memref<16x128xf32, #tpu.memory_space<vmem>>, %arg2: memref<128x128xf32, #tpu.memory_space<vmem>>, %arg3: memref<128x128xf32, #tpu.memory_space<vmem>>, %arg4: memref<4x128xf32, #tpu.memory_space<vmem>>, %arg5: memref<16x128xf32, #tpu.memory_space<vmem>>) attributes {dimension_semantics = [#tpu.dimension_semantics<parallel>], iteration_bounds = array<i64: 1>, scalar_prefetch = 0 : i64, scratch_operands = 0 : i64, tpu.core_type = #tpu.core_type<tc>, window_params = [{transform_indices = @transform_0, window_bounds = array<i64: 16, 128>}, {pipeline_mode = #tpu.pipeline_mode<synchronous>, transform_indices = @transform_1, window_bounds = array<i64: 128, 128>}, {pipeline_mode = #tpu.pipeline_mode<synchronous>, transform_indices = @transform_2, window_bounds = array<i64: 128, 128>}, {pipeline_mode = #tpu.pipeline_mode<synchronous>, transform_indices = @transform_3, window_bounds = array<i64: 4, 128>}, {transform_indices = @transform_4, window_bounds = array<i64: 16, 128>}]} {
    %c0 = arith.constant 0 : index
    %c0_0 = arith.constant 0 : index
    %0 = vector.load %arg1[%c0, %c0_0] : memref<16x128xf32, #tpu.memory_space<vmem>>, vector<16x128xf32>
    %c0_1 = arith.constant 0 : index
    %c0_2 = arith.constant 0 : index
    %1 = vector.load %arg4[%c0_1, %c0_2] : memref<4x128xf32, #tpu.memory_space<vmem>>, vector<1x128xf32>
    %c1 = arith.constant 1 : index
    %c0_3 = arith.constant 0 : index
    %2 = vector.load %arg4[%c1, %c0_3] : memref<4x128xf32, #tpu.memory_space<vmem>>, vector<1x128xf32>
    %c2 = arith.constant 2 : index
    %c0_4 = arith.constant 0 : index
    %3 = vector.load %arg4[%c2, %c0_4] : memref<4x128xf32, #tpu.memory_space<vmem>>, vector<1x128xf32>
    %c3 = arith.constant 3 : index
    %c0_5 = arith.constant 0 : index
    %4 = vector.load %arg4[%c3, %c0_5] : memref<4x128xf32, #tpu.memory_space<vmem>>, vector<1x128xf32>
    %c0_6 = arith.constant 0 : index
    %c0_7 = arith.constant 0 : index
    %5 = vector.load %arg2[%c0_6, %c0_7] : memref<128x128xf32, #tpu.memory_space<vmem>>, vector<128x128xf32>
    %cst = arith.constant dense<0.000000e+00> : vector<16x128xf32>
    %6 = tpu.matmul %0, %5, %cst {dimension_numbers = #tpu.dot_dimension_numbers<[1], [0], [0], [1], [0, 0, 1, 1], [], []>} : vector<16x128xf32>, vector<128x128xf32>, vector<16x128xf32> -> vector<16x128xf32>
    %7 = vector.broadcast %1 : vector<1x128xf32> to vector<16x128xf32>
    %8 = arith.addf %6, %7 : vector<16x128xf32>
    %cst_8 = arith.constant 0.000000e+00 : f32
    %9 = vector.broadcast %cst_8 : f32 to vector<16x128xf32>
    %10 = arith.maximumf %8, %9 : vector<16x128xf32>
    %c0_9 = arith.constant 0 : index
    %c0_10 = arith.constant 0 : index
    %11 = vector.load %arg3[%c0_9, %c0_10] : memref<128x128xf32, #tpu.memory_space<vmem>>, vector<128x128xf32>
    %cst_11 = arith.constant dense<0.000000e+00> : vector<16x128xf32>
    %12 = tpu.matmul %10, %11, %cst_11 {dimension_numbers = #tpu.dot_dimension_numbers<[1], [0], [0], [1], [0, 0, 1, 1], [], []>} : vector<16x128xf32>, vector<128x128xf32>, vector<16x128xf32> -> vector<16x128xf32>
    %13 = vector.broadcast %2 : vector<1x128xf32> to vector<16x128xf32>
    %14 = arith.addf %12, %13 : vector<16x128xf32>
    %15 = arith.addf %0, %14 : vector<16x128xf32>
    %cst_12 = arith.constant dense<0.000000e+00> : vector<16xf32>
    %16 = vector.multi_reduction <add>, %15, %cst_12 [1] : vector<16x128xf32> to vector<16xf32>
    %17 = vector.shape_cast %16 : vector<16xf32> to vector<16x1xf32>
    %18 = arith.mulf %15, %15 : vector<16x128xf32>
    %cst_13 = arith.constant dense<0.000000e+00> : vector<16xf32>
    %19 = vector.multi_reduction <add>, %18, %cst_13 [1] : vector<16x128xf32> to vector<16xf32>
    %20 = vector.shape_cast %19 : vector<16xf32> to vector<16x1xf32>
    %cst_14 = arith.constant 3.200000e+01 : f32
    %21 = vector.broadcast %cst_14 : f32 to vector<16x1xf32>
    %22 = arith.divf %17, %21 : vector<16x1xf32>
    %cst_15 = arith.constant 3.200000e+01 : f32
    %23 = vector.broadcast %cst_15 : f32 to vector<16x1xf32>
    %24 = arith.mulf %23, %22 : vector<16x1xf32>
    %25 = arith.mulf %24, %22 : vector<16x1xf32>
    %26 = arith.subf %20, %25 : vector<16x1xf32>
    %cst_16 = arith.constant 3.100000e+01 : f32
    %27 = vector.broadcast %cst_16 : f32 to vector<16x1xf32>
    %28 = arith.divf %26, %27 : vector<16x1xf32>
    %cst_17 = arith.constant 0.000000e+00 : f32
    %29 = vector.broadcast %cst_17 : f32 to vector<16x1xf32>
    %30 = arith.maximumf %28, %29 : vector<16x1xf32>
    %31 = math.sqrt %30 : vector<16x1xf32>
    %cst_18 = arith.constant 9.99999997E-7 : f32
    %32 = vector.broadcast %cst_18 : f32 to vector<16x1xf32>
    %33 = arith.addf %31, %32 : vector<16x1xf32>
    %34 = tpu.reciprocal %33 : vector<16x1xf32> -> vector<16x1xf32>
    %35 = vector.broadcast %22 : vector<16x1xf32> to vector<16x128xf32>
    %36 = arith.subf %15, %35 : vector<16x128xf32>
    %37 = vector.broadcast %34 : vector<16x1xf32> to vector<16x128xf32>
    %38 = arith.mulf %36, %37 : vector<16x128xf32>
    %39 = vector.broadcast %3 : vector<1x128xf32> to vector<16x128xf32>
    %40 = arith.mulf %39, %38 : vector<16x128xf32>
    %41 = vector.broadcast %4 : vector<1x128xf32> to vector<16x128xf32>
    %42 = arith.addf %40, %41 : vector<16x128xf32>
    %c0_19 = arith.constant 0 : index
    %c0_20 = arith.constant 0 : index
    %43 = vector.load %arg5[%c0_19, %c0_20] : memref<16x128xf32, #tpu.memory_space<vmem>>, vector<16x128xf32>
    tpu.vector_store %arg5[%c0_19, %c0_20], %42 {strides = array<i32>} : memref<16x128xf32, #tpu.memory_space<vmem>>, vector<16x128xf32>,
    return
  }
  func.func @transform_0(%arg0: i32) -> (i32, i32) {
    %c0_i32 = arith.constant 0 : i32
    %c0_i32_0 = arith.constant 0 : i32
    return %arg0, %c0_i32 : i32, i32
  }
  func.func @transform_1(%arg0: i32) -> (i32, i32) {
    %c0_i32 = arith.constant 0 : i32
    %c0_i32_0 = arith.constant 0 : i32
    %c0_i32_1 = arith.constant 0 : i32
    return %c0_i32, %c0_i32_0 : i32, i32
  }
  func.func @transform_2(%arg0: i32) -> (i32, i32) {
    %c0_i32 = arith.constant 0 : i32
    %c0_i32_0 = arith.constant 0 : i32
    %c0_i32_1 = arith.constant 0 : i32
    return %c0_i32, %c0_i32_0 : i32, i32
  }
  func.func @transform_3(%arg0: i32) -> (i32, i32) {
    %c0_i32 = arith.constant 0 : i32
    %c0_i32_0 = arith.constant 0 : i32
    %c0_i32_1 = arith.constant 0 : i32
    return %c0_i32, %c0_i32_0 : i32, i32
  }
  func.func @transform_4(%arg0: i32) -> (i32, i32) {
    %c0_i32 = arith.constant 0 : i32
    %c0_i32_0 = arith.constant 0 : i32
    return %arg0, %c0_i32 : i32, i32
  }
}

</mosaic_0001>

<bundles_post_ra>
// kernel: tpu_custom_call.1
= control target key start
LH: loop header
LB: loop body
LE: loop exit
PB: predicated region body
PF: predicated region fallthrough
CT: control target
= control target key end

     0   :  { %9 = vsyncpa [#allocation3], 0  ;;  %s560_s0 = inlined_call_operand.hbm [shape: f32[16,128], index: 0, kind: input, shape index: {}]   ;;  %s561_s1 = inlined_call_operand.hbm [shape: f32[128,128], index: 1, kind: input, shape index: {}]   ;;  %s562_s2 = inlined_call_operand.hbm [shape: f32[128,128], index: 2, kind: input, shape index: {}]   ;;  %s563_s3 = inlined_call_operand.hbm [shape: f32[4,128], index: 3, kind: input, shape index: {}]   ;;  %s564_s4 = inlined_call_operand.hbm [shape: f32[16,128], index: 4, kind: output, shape index: {}]  }
   0x1   :  { %10 = vsyncpa [#allocation6], 0 }
   0x2   :  { %11 = vsyncpa [#allocation9], 0 }
   0x3   :  { %12 = vsyncpa [#allocation4], 0  ;;  %s30_s17 = sshll.u32 %s561_s1, 4  ;;  %s477_s18 = smov [#allocation5]   ;;  %s31_s17 = int_to_ptr.hbm [resolvable:$true] %s30_s17 }
   0x4   :  { %s32_s19 = sshll.u32 %s477_s18, 4  ;;  %s17_s22 = sshll.u32 %s560_s0, 4  ;;  %s33_s19 = int_to_ptr.vmem [resolvable:$true] %s32_s19  ;;  %s18_s22 = int_to_ptr.hbm [resolvable:$true] %s17_s22 }
   0x5   :  { %s478_s23 = smov 128   ;;  %s479_s24 = smov 8  }
   0x6   :  { %38 = dma.hbm_to_vmem [thread:$0]  %s31_s17, 2048, %s33_s19, [#allocation6], %s478_s23, %s478_s23, %s479_s24  }
   0x7   :  { %s480_s25 = smov [#allocation2]   ;;  %s43_s1 = sshll.u32 %s562_s2, 4  ;;  %s44_s1 = int_to_ptr.hbm [resolvable:$true] %s43_s1 }
   0x8   :  { %s19_s26 = sshll.u32 %s480_s25, 4  ;;  %s57_s30 = sshll.u32 %s563_s3, 4  ;;  %s20_s26 = int_to_ptr.vmem [resolvable:$true] %s19_s26  ;;  %s58_s30 = int_to_ptr.hbm [resolvable:$true] %s57_s30 }
   0x9   :  { %25 = dma.hbm_to_vmem [thread:$0]  %s18_s22, 256, %s20_s26, [#allocation3], %s478_s23, %s478_s23, %s479_s24  }
   0xa   :  { %s481_s5 = smov [#allocation7]   ;;  %s482_s7 = smov [#allocation8]  }
   0xb   :  { %s45_s6 = sshll.u32 %s481_s5, 4  ;;  %s59_s2 = sshll.u32 %s482_s7, 4  ;;  %s46_s6 = int_to_ptr.vmem [resolvable:$true] %s45_s6  ;;  %s60_s2 = int_to_ptr.vmem [resolvable:$true] %s59_s2 }
   0xc   :  { %51 = dma.hbm_to_vmem [thread:$0]  %s44_s1, 2048, %s46_s6, [#allocation6], %s478_s23, %s478_s23, %s479_s24  }
   0xd   :  { %62 = dma.hbm_to_vmem [thread:$0]  %s58_s30, 64, %s60_s2, [#allocation9]  }
   0xe   :  { %469 = dma.done.wait [#allocation3], 256  }
   0xf   :  { %470 = vsyncadd [#allocation3], 4294967040 }
  0x10   :  { %471 = dma.done.wait [#allocation6], 4096  }
  0x11   :  { %472 = vsyncadd [#allocation6], 4294963200 }
  0x12   :  { %473 = dma.done.wait [#allocation9], 64  }
  0x13   :  { %474 = vsyncadd [#allocation9], 4294967232  ;;  %v100_v0 = vld [vmem:[#allocation5 + $0x78] sm:$0xff]  ;;  %v99_v1 = vld [vmem:[#allocation5 + $0x70] sm:$0xff]  ;;  %v483_v50 = vmov 32.0   ;;  %v484_v52 = vmov 31.0  }
  0x14   :  { %102 = vmatpush.msra.mxu0 %v100_v0  ;;  %292 = vmatpush.msra.mxu2 %v100_v0  ;;  %v98_v2 = vld [vmem:[#allocation5 + $0x68] sm:$0xff]  ;;  %v97_v3 = vld [vmem:[#allocation5 + $0x60] sm:$0xff]  ;;  %v96_v4 = vld [vmem:[#allocation5 + $0x58] sm:$0xff]  ;;  %337 = vrcp.f32 %v483_v50  ;;  %s485_s3 = smov [#allocation10]   ;;  %s277_s11 = sshll.u32 %s564_s4, 4  ;;  %s278_s11 = int_to_ptr.hbm [resolvable:$true] %s277_s11 }
  0x15   :  { %v142_v5 = vld [vmem:[#allocation7 + $0x78] sm:$0xff]  ;;  %v141_v6 = vld [vmem:[#allocation7 + $0x70] sm:$0xff]  ;;  %v140_v8 = vld [vmem:[#allocation7 + $0x68] sm:$0xff]  ;;  %339 = vrcp.f32 %v484_v52  ;;  %s275_s8 = sshll.u32 %s485_s3, 4  ;;  %s276_s8 = int_to_ptr.vmem [resolvable:$true] %s275_s8 }
  0x16   :  { %103 = vmatpush.msra.mxu0 %v99_v1  ;;  %293 = vmatpush.msra.mxu2 %v99_v1  ;;  %v95_v7 = vld [vmem:[#allocation5 + $0x50] sm:$0xff]  ;;  %v94_v9 = vld [vmem:[#allocation5 + $0x48] sm:$0xff]  ;;  %v139_v10 = vld [vmem:[#allocation7 + $0x60] sm:$0xff] }
  0x17   :  { %144 = vmatpush.msra.mxu1 %v142_v5  ;;  %308 = vmatpush.msra.mxu3 %v142_v5  ;;  %v93_v11 = vld [vmem:[#allocation5 + $0x40] sm:$0xff]  ;;  %v138_v12 = vld [vmem:[#allocation7 + $0x58] sm:$0xff]  ;;  %v137_v14 = vld [vmem:[#allocation7 + $0x50] sm:$0xff] }
  0x18   :  { %104 = vmatpush.msra.mxu0 %v98_v2  ;;  %294 = vmatpush.msra.mxu2 %v98_v2  ;;  %v92_v13 = vld [vmem:[#allocation5 + $0x38] sm:$0xff]  ;;  %v91_v15 = vld [vmem:[#allocation5 + $0x30] sm:$0xff]  ;;  %v136_v16 = vld [vmem:[#allocation7 + $0x48] sm:$0xff] }
  0x19   :  { %145 = vmatpush.msra.mxu1 %v141_v6  ;;  %309 = vmatpush.msra.mxu3 %v141_v6  ;;  %v90_v17 = vld [vmem:[#allocation5 + $0x28] sm:$0xff]  ;;  %v135_v18 = vld [vmem:[#allocation7 + $0x40] sm:$0xff]  ;;  %v134_v20 = vld [vmem:[#allocation7 + $0x38] sm:$0xff] }
  0x1a   :  { %105 = vmatpush.msra.mxu0 %v97_v3  ;;  %295 = vmatpush.msra.mxu2 %v97_v3  ;;  %v89_v19 = vld [vmem:[#allocation5 + $0x20] sm:$0xff]  ;;  %v88_v21 = vld [vmem:[#allocation5 + $0x18] sm:$0xff]  ;;  %v133_v22 = vld [vmem:[#allocation7 + $0x30] sm:$0xff]  ;;  %v338_v51 = vpop.eup %337 }
  0x1b   :  { %146 = vmatpush.msra.mxu1 %v140_v8  ;;  %310 = vmatpush.msra.mxu3 %v140_v8  ;;  %v87_v23 = vld [vmem:[#allocation5 + $0x10] sm:$0xff]  ;;  %v132_v24 = vld [vmem:[#allocation7 + $0x28] sm:$0xff]  ;;  %v131_v26 = vld [vmem:[#allocation7 + $0x20] sm:$0xff]  ;;  %v180_v53 = vmul.f32 32.0, %v338_v51  ;;  %v340_v55 = vpop.eup %339  ;;  %vm184_vm0 = vweird.f32 %v338_v51 }
  0x1c   :  { %106 = vmatpush.msra.mxu0 %v96_v4  ;;  %296 = vmatpush.msra.mxu2 %v96_v4  ;;  %v86_v25 = vld [vmem:[#allocation5 + $0x8] sm:$0xff]  ;;  %v85_v27 = vld [vmem:[#allocation5] sm:$0xff]  ;;  %v79_v28 = vld [vmem:[#allocation2] sm:$0xff]  ;;  %v195_v57 = vmul.f32 31.0, %v340_v55  ;;  %vm199_vm1 = vweird.f32 %v340_v55 }
  0x1d   :  { %147 = vmatpush.msra.mxu1 %v139_v10  ;;  %311 = vmatpush.msra.mxu3 %v139_v10  ;;  %v80_v29 = vld [vmem:[#allocation2 + $0x8] sm:$0xff]  ;;  %v129_v31 = vld [vmem:[#allocation7 + $0x10] sm:$0xff]  ;;  %v128_v32 = vld [vmem:[#allocation7 + $0x8] sm:$0xff]  ;;  %v181_v54 = vsub.f32 1.0, %v180_v53 }
  0x1e   :  { %107 = vmatpush.msra.mxu0 %v95_v7  ;;  %297 = vmatpush.msra.mxu2 %v95_v7  ;;  %v130_v30 = vld [vmem:[#allocation7 + $0x18] sm:$0xff]  ;;  %v127_v33 = vld [vmem:[#allocation7] sm:$0xff]  ;;  %v196_v59 = vsub.f32 1.0, %v195_v57 }
  0x1f   :  { %148 = vmatpush.msra.mxu1 %v138_v12  ;;  %312 = vmatpush.msra.mxu3 %v138_v12  ;;  %v333_v34 = vld [vmem:[#allocation8] ss:$0 sm:$0xff]  ;;  %v334_v41 = vld [vmem:[#allocation8 + $0x1] ss:$0 sm:$0xff]  ;;  %v182_v56 = vmul.f32 %v338_v51, %v181_v54  ;;  %v335_v50 = vld [vmem:[#allocation8 + $0x2] ss:$0 sm:$0xff] }
  0x20   :  { %108 = vmatpush.msra.mxu0 %v94_v9  ;;  %298 = vmatpush.msra.mxu2 %v94_v9  ;;  %v197_v61 = vmul.f32 %v340_v55, %v196_v59  ;;  %v336_v53 = vld [vmem:[#allocation8 + $0x3] ss:$0 sm:$0xff] }
  0x21   :  { %149 = vmatpush.msra.mxu1 %v137_v14  ;;  %313 = vmatpush.msra.mxu3 %v137_v14  ;;  %v183_v58 = vadd.f32 %v338_v51, %v182_v56 }
  0x22   :  { %109 = vmatpush.msra.mxu0 %v93_v11  ;;  %299 = vmatpush.msra.mxu2 %v93_v11  ;;  %v198_v0 = vadd.f32 %v340_v55, %v197_v61 }
  0x23   :  { %150 = vmatpush.msra.mxu1 %v136_v16  ;;  %314 = vmatpush.msra.mxu3 %v136_v16  ;;  %v185_v60 = vsel %vm184_vm0, %v338_v51, %v183_v58 }
  0x24   :  { %110 = vmatpush.msra.mxu0 %v92_v13  ;;  %300 = vmatpush.msra.mxu2 %v92_v13  ;;  %v200_v4 = vsel %vm199_vm1, %v340_v55, %v198_v0 }
  0x25   :  { %151 = vmatpush.msra.mxu1 %v135_v18  ;;  %315 = vmatpush.msra.mxu3 %v135_v18 }
  0x26   :  { %111 = vmatpush.msra.mxu0 %v91_v15  ;;  %301 = vmatpush.msra.mxu2 %v91_v15 }
  0x27   :  { %152 = vmatpush.msra.mxu1 %v134_v20  ;;  %316 = vmatpush.msra.mxu3 %v134_v20 }
  0x28   :  { %112 = vmatpush.msra.mxu0 %v90_v17  ;;  %302 = vmatpush.msra.mxu2 %v90_v17 }
  0x29   :  { %153 = vmatpush.msra.mxu1 %v133_v22  ;;  %317 = vmatpush.msra.mxu3 %v133_v22 }
  0x2a   :  { %113 = vmatpush.msra.mxu0 %v89_v19  ;;  %303 = vmatpush.msra.mxu2 %v89_v19 }
  0x2b   :  { %154 = vmatpush.msra.mxu1 %v132_v24  ;;  %318 = vmatpush.msra.mxu3 %v132_v24 }
  0x2c   :  { %114 = vmatpush.msra.mxu0 %v88_v21  ;;  %304 = vmatpush.msra.mxu2 %v88_v21 }
  0x2d   :  { %155 = vmatpush.msra.mxu1 %v131_v26  ;;  %319 = vmatpush.msra.mxu3 %v131_v26 }
  0x2e   :  { %115 = vmatpush.msra.mxu0 %v87_v23  ;;  %305 = vmatpush.msra.mxu2 %v87_v23 }
  0x2f   :  { %156 = vmatpush.msra.mxu1 %v130_v30  ;;  %320 = vmatpush.msra.mxu3 %v130_v30 }
  0x30   :  { %116 = vmatpush.msra.mxu0 %v86_v25  ;;  %306 = vmatpush.msra.mxu2 %v86_v25 }
  0x31   :  { %157 = vmatpush.msra.mxu1 %v129_v31  ;;  %321 = vmatpush.msra.mxu3 %v129_v31 }
  0x32   :  { %117 = vmatpush.msra.mxu0 %v85_v27  ;;  %307 = vmatpush.msra.mxu2 %v85_v27 }
  0x33   :  { %118 = vmatmul.f32.vlgmr.msra.gmra.mxu0 %v79_v28  ;;  %121 = vmatmul.f32.vlgmr.msra.gmra.mxu2 %v80_v29 }
  0x34   :  { %158 = vmatpush.msra.mxu1 %v128_v32  ;;  %322 = vmatpush.msra.mxu3 %v128_v32 }
  0x36   :  { %159 = vmatpush.msra.mxu1 %v127_v33  ;;  %323 = vmatpush.msra.mxu3 %v127_v33 }
  0xb0   :  { %v119_v35 = vpop.f32.mrf.mxu0 }
  0xb1   :  { %v120_v36 = vadd.f32 %v333_v34, %v119_v35 }
  0xb3   :  { %v125_v37 = vmax.f32 %v120_v36, 0.0 }
  0xb5   :  { %160 = vmatmul.f32.vlgmr.msra.gmra.mxu1 %v125_v37 }
  0xb6   :  { %v122_v38 = vpop.f32.mrf.mxu2 }
  0xb7   :  { %v123_v39 = vadd.f32 %v333_v34, %v122_v38 }
  0xb9   :  { %v126_v40 = vmax.f32 %v123_v39, 0.0 }
  0xbb   :  { %163 = vmatmul.f32.vlgmr.msra.gmra.mxu3 %v126_v40 }
 0x132   :  { %v161_v42 = vpop.f32.mrf.mxu1 }
 0x133   :  { %v162_v43 = vadd.f32 %v334_v41, %v161_v42 }
 0x135   :  { %v532_v44 = vadd.f32 %v162_v43, %v79_v28 }
 0x137   :  { %169 = vadd.xlane.f32.xlu0 %v532_v44  ;;  %v173_v45 = vmul.f32 %v532_v44, %v532_v44 }
 0x139   :  { %175 = vadd.xlane.f32.xlu1 %v173_v45 }
 0x13e   :  { %v164_v46 = vpop.f32.mrf.mxu3 }
 0x13f   :  { %v165_v47 = vadd.f32 %v334_v41, %v164_v46 }
 0x141   :  { %v537_v48 = vadd.f32 %v165_v47, %v80_v29 }
 0x143   :  { %171 = vadd.xlane.f32.xlu0 %v537_v48  ;;  %v174_v49 = vmul.f32 %v537_v48, %v537_v48 }
 0x145   :  { %177 = vadd.xlane.f32.xlu1 %v174_v49 }
 0x1aa   :  { %v170_v62 = vpop.xlane.xlu0 %169 }
 0x1ab   :  { %v542_v63 = vmul.f32 %v185_v60, %v170_v62 }
 0x1ac   :  { %v176_v2 = vpop.xlane.xlu1 %175 }
 0x1ad   :  { %v188_v1 = vmul.f32 32.0, %v542_v63  ;;  %v259_v47 = vsub.f32 %v532_v44, %v542_v63 }
 0x1af   :  { %v190_v3 = vmul.f32 %v188_v1, %v542_v63 }
 0x1b1   :  { %v192_v5 = vsub.f32 %v176_v2, %v190_v3 }
 0x1b3   :  { %v201_v6 = vmul.f32 %v200_v4, %v192_v5 }
 0x1b5   :  { %v203_v7 = vmax.f32 %v201_v6, 0.0 }
 0x1b6   :  { %v172_v8 = vpop.xlane.xlu0 %171 }
 0x1b7   :  { %341 = vrsqrt.f32 %v203_v7  ;;  %v546_v9 = vmul.f32 %v185_v60, %v172_v8  ;;  %vm212_vm2 = vcmp.eq.f32.partialorder %v203_v7, inf  ;;  %v215_v23 = vand.u32 2147483648, %v203_v7 }
 0x1b8   :  { %v178_v13 = vpop.xlane.xlu1 %177  ;;  %vm214_vm3 = vcmp.eq.f32.partialorder %v203_v7, 0.0 }
 0x1b9   :  { %v189_v10 = vmul.f32 32.0, %v546_v9  ;;  %v260_v63 = vsub.f32 %v537_v48, %v546_v9 }
 0x1bb   :  { %v191_v11 = vmul.f32 %v189_v10, %v546_v9 }
 0x1bd   :  { %v342_v12 = vpop.eup %341  ;;  %v193_v15 = vsub.f32 %v178_v13, %v191_v11 }
 0x1be   :  { %v206_v14 = vmul.f32 %v342_v12, %v203_v7 }
 0x1bf   :  { %v202_v17 = vmul.f32 %v200_v4, %v193_v15 }
 0x1c0   :  { %v207_v16 = vmul.f32 %v342_v12, %v206_v14 }
 0x1c1   :  { %v204_v19 = vmax.f32 %v202_v17, 0.0 }
 0x1c2   :  { %v208_v18 = vmul.f32 0.5, %v207_v16 }
 0x1c3   :  { %343 = vrsqrt.f32 %v204_v19  ;;  %vm224_vm4 = vcmp.eq.f32.partialorder %v204_v19, inf  ;;  %v227_v36 = vand.u32 2147483648, %v204_v19  ;;  %vm226_vm5 = vcmp.eq.f32.partialorder %v204_v19, 0.0 }
 0x1c4   :  { %v209_v20 = vsub.f32 1.5, %v208_v18 }
 0x1c6   :  { %v210_v21 = vmul.f32 %v342_v12, %v209_v20 }
 0x1c8   :  { %v211_v22 = vmul.f32 %v210_v21, %v203_v7 }
 0x1c9   :  { %v344_v24 = vpop.eup %343 }
 0x1ca   :  { %v213_v25 = vsel %vm212_vm2, %v203_v7, %v211_v22  ;;  %v218_v26 = vmul.f32 %v344_v24, %v204_v19 }
 0x1cb   :  { %v216_v27 = vsel %vm214_vm3, %v215_v23, %v213_v25 }
 0x1cc   :  { %v229_v28 = vadd.f32 1e-06, %v216_v27  ;;  %v219_v29 = vmul.f32 %v344_v24, %v218_v26 }
 0x1ce   :  { %345 = vrcp.f32 %v229_v28  ;;  %v220_v30 = vmul.f32 0.5, %v219_v29  ;;  %v242_v40 = vand.u32 2147483648, %v229_v28  ;;  %v240_v43 = vand.u32 2147483647, %v229_v28 }
 0x1cf   :  { %vm236_vm7 = vweird.f32 %v229_v28 }
 0x1d0   :  { %v221_v31 = vsub.f32 1.5, %v220_v30  ;;  %v243_v46 = vor.u32 1.1754944e-38, %v242_v40  ;;  %vm241_vm9 = vcmp.eq.f32.partialorder %v240_v43, 8.507059e+37 }
 0x1d2   :  { %v222_v32 = vmul.f32 %v344_v24, %v221_v31 }
 0x1d4   :  { %v346_v33 = vpop.eup %345  ;;  %v223_v34 = vmul.f32 %v222_v32, %v204_v19 }
 0x1d5   :  { %v232_v35 = vmul.f32 %v346_v33, %v229_v28  ;;  %vm237_vm6 = vweird.f32 %v346_v33 }
 0x1d6   :  { %v225_v37 = vsel %vm224_vm4, %v204_v19, %v223_v34  ;;  %vm238_vm8 = vmor %vm236_vm7, %vm237_vm6 }
 0x1d7   :  { %v233_v38 = vsub.f32 1.0, %v232_v35  ;;  %v228_v39 = vsel %vm226_vm5, %v227_v36, %v225_v37 }
 0x1d8   :  { %v230_v41 = vadd.f32 1e-06, %v228_v39 }
 0x1d9   :  { %v234_v42 = vmul.f32 %v346_v33, %v233_v38 }
 0x1da   :  { %347 = vrcp.f32 %v230_v41  ;;  %v256_v59 = vand.u32 2147483648, %v230_v41  ;;  %v254_v61 = vand.u32 2147483647, %v230_v41  ;;  %vm250_vm11 = vweird.f32 %v230_v41 }
 0x1db   :  { %v235_v45 = vadd.f32 %v346_v33, %v234_v42 }
 0x1dc   :  { %v257_v44 = vor.u32 1.1754944e-38, %v256_v59  ;;  %vm255_vm13 = vcmp.eq.f32.partialorder %v254_v61, 8.507059e+37 }
 0x1dd   :  { %v239_v49 = vsel %vm238_vm8, %v346_v33, %v235_v45 }
 0x1de   :  { %v244_v51 = vsel %vm241_vm9, %v243_v46, %v239_v49 }
 0x1df   :  { %v261_v52 = vmul.f32 %v259_v47, %v244_v51 }
 0x1e0   :  { %v348_v54 = vpop.eup %347 }
 0x1e1   :  { %v264_v55 = vmul.f32 %v335_v50, %v261_v52  ;;  %v246_v56 = vmul.f32 %v348_v54, %v230_v41  ;;  %vm251_vm10 = vweird.f32 %v348_v54 }
 0x1e2   :  { %vm252_vm12 = vmor %vm250_vm11, %vm251_vm10 }
 0x1e3   :  { %v267_v57 = vadd.f32 %v336_v53, %v264_v55  ;;  %v247_v58 = vsub.f32 1.0, %v246_v56 }
 0x1e5   :  { %269 = vst [vmem:[#allocation10] sm:$0xff] %v267_v57  ;;  %v248_v60 = vmul.f32 %v348_v54, %v247_v58 }
 0x1e7   :  { %v249_v62 = vadd.f32 %v348_v54, %v248_v60 }
 0x1e9   :  { %v253_v0 = vsel %vm252_vm12, %v348_v54, %v249_v62 }
 0x1ea   :  { %v258_v1 = vsel %vm255_vm13, %v257_v44, %v253_v0 }
 0x1eb   :  { %v262_v2 = vmul.f32 %v260_v63, %v258_v1 }
 0x1ed   :  { %v265_v3 = vmul.f32 %v335_v50, %v262_v2 }
 0x1ef   :  { %v268_v4 = vadd.f32 %v336_v53, %v265_v3 }
 0x1f1   :  { %270 = vst [vmem:[#allocation10 + $0x8] sm:$0xff] %v268_v4 }
 0x1f2   :  { %283 = dma.vmem_to_hbm [thread:$0]  %s276_s8, 256, %s278_s11, [#allocation4], %s478_s23, %s478_s23, %s479_s24  }
 0x1f3   :  { %475 = dma.done.wait [#allocation4], 256  }
 0x1f4   :  { %476 = vsyncadd [#allocation4], 4294967040 }
 0x1f5   :  { %288 = vsyncpa [#allocation3], 1 }
 0x1f6   :  { %289 = vsyncpa [#allocation6], 1 }
 0x1f7   :  { %290 = vsyncpa [#allocation9], 1 }
 0x1f8   :  { %291 = vsyncpa [#allocation4], 1 }

</bundles_post_ra>
